<compile_context>
chip_gen: v7x
topology: tpu7x:2x2x1
jax: 0.10.0
libtpu: 0.0.40
codegen_flags: <defaults>
</compile_context>

<pallas_src>
import functools

import jax
import jax.numpy as jnp
from jax.experimental import pallas as pl
from jax.experimental.pallas import tpu as pltpu

D_IN, D_H1, D_H2, D_OUT = 64, 128, 64, 10
D_H2_PAD = 128   # pad hidden-2 to full lane width: lane-dense h2, full MXU contraction
D_OUT_PAD = 128  # pad fc3 output to full lane width: unmasked lane-dense stores


def mlp_kernel(x_ref, w1_ref, b1_ref, w2_ref, b2_ref, w3_ref, b3_ref, o_ref):
    # f32 MXU matmuls (matches the f32 PyTorch module; kernel is mem/overhead-bound so
    # f32 compute costs ~nothing). Bias+ReLU epilogue in f32 (v5e has no bf16 VPU).
    # Only the final store is cast to bf16 to halve HBM writeback.
    x = x_ref[...]
    h1 = jnp.dot(x, w1_ref[...], preferred_element_type=jnp.float32) + b1_ref[...]
    h1 = jnp.maximum(h1, 0.0)
    h2 = jnp.dot(h1, w2_ref[...], preferred_element_type=jnp.float32) + b2_ref[...]
    h2 = jnp.maximum(h2, 0.0)
    o = jnp.dot(h2, w3_ref[...], preferred_element_type=jnp.float32) + b3_ref[...]
    o_ref[...] = o.astype(o_ref.dtype)


def _round_up(n, m):
    return ((n + m - 1) // m) * m


def prepare_params(params):
    """One-time parameter prep (hoisted out of the per-call forward).

    Pads hidden-2 (64->128) and the fc3 output (10->128) with zeros; padded h2 lanes
    are ReLU(0 + 0) = 0 and padded w3 rows are 0, so results are unchanged.
    """
    w1, b1, w2, b2, w3, b3 = params
    w1_p = w1.astype(jnp.float32)                                          # (64, 128)
    b1_p = b1.reshape(1, D_H1).astype(jnp.float32)                         # (1, 128)
    w2_p = jnp.zeros((D_H1, D_H2_PAD), jnp.float32).at[:, :D_H2].set(w2)   # (128, 128)
    b2_p = jnp.zeros((1, D_H2_PAD), jnp.float32).at[:, :D_H2].set(b2.reshape(1, D_H2))
    w3_p = jnp.zeros((D_H2_PAD, D_OUT_PAD), jnp.float32).at[:D_H2, :D_OUT].set(w3)
    b3_p = jnp.zeros((1, D_OUT_PAD), jnp.float32).at[:, :D_OUT].set(b3.reshape(1, D_OUT))
    return (w1_p, b1_p, w2_p, b2_p, w3_p, b3_p)


@functools.partial(jax.jit, static_argnames=("tm",))
def simple_nn_forward_padded(x, prepped, *, tm=1024):
    """x: (B, 64) f32. prepped: output of prepare_params. Returns (B_pad, 128) bf16."""
    w1, b1, w2, b2, w3, b3 = prepped
    B = x.shape[0]
    x = x.astype(jnp.float32)

    # Batch tile: multiple of 16 (bf16 output sublane packing). Large default (1024)
    # amortizes the ~0.35 us per-grid-step overhead; VMEM use stays at a few MiB.
    b16 = _round_up(max(B, 1), 16)
    TM = min(tm, b16)
    # v7x: keep >= 2 grid tiles for large batches so "parallel" shards across both TCs.
    if TM == b16 and b16 >= 512:
        TM = _round_up(b16 // 2, 16)
    B_pad = _round_up(B, TM)
    if B_pad != B:
        x = jnp.pad(x, ((0, B_pad - B), (0, 0)))

    grid = (B_pad // TM,)

    def resident(shape):
        # Same block index every grid step -> block stays VMEM-resident, no re-DMA.
        return pl.BlockSpec(shape, lambda i: (0, 0))

    flops = 2 * B_pad * (D_IN * D_H1 + D_H1 * D_H2_PAD + D_H2_PAD * D_OUT_PAD)
    bytes_accessed = (
        B_pad * D_IN * 4                                              # x (f32)
        + (D_IN * D_H1 + D_H1 * D_H2_PAD + D_H2_PAD * D_OUT_PAD) * 4  # weights (f32)
        + (D_H1 + D_H2_PAD + D_OUT_PAD) * 4                           # biases (f32)
        + B_pad * D_OUT_PAD * 2                                       # output (bf16)
    )

    out = pl.pallas_call(
        mlp_kernel,
        out_shape=jax.ShapeDtypeStruct((B_pad, D_OUT_PAD), jnp.bfloat16),
        grid=grid,
        in_specs=[
            pl.BlockSpec((TM, D_IN), lambda i: (i, 0)),  # x tile, auto double-buffered
            resident((D_IN, D_H1)),
            resident((1, D_H1)),
            resident((D_H1, D_H2_PAD)),
            resident((1, D_H2_PAD)),
            resident((D_H2_PAD, D_OUT_PAD)),
            resident((1, D_OUT_PAD)),
        ],
        out_specs=pl.BlockSpec((TM, D_OUT_PAD), lambda i: (i, 0)),
        compiler_params=pltpu.CompilerParams(
            dimension_semantics=("parallel",),  # batch tiles shard across v7x's 2 TCs
        ),
        cost_estimate=pl.CostEstimate(
            flops=flops, transcendentals=0, bytes_accessed=bytes_accessed
        ),
    )(x, w1, b1, w2, b2, w3, b3)
    return out


def simple_nn_forward(x, prepped, *, tm=1024):
    """Thin consumer wrapper: lazily slice the padded lane-dense output to (B, 10)."""
    out_padded = simple_nn_forward_padded(x, prepped, tm=tm)
    return out_padded[: x.shape[0], :D_OUT].astype(jnp.float32)


def init_params(key):
    # PyTorch nn.Linear default init: U(-1/sqrt(fan_in), 1/sqrt(fan_in)) for W and b.
    def linear(key, fan_in, fan_out):
        kw, kb = jax.random.split(key)
        bound = 1.0 / jnp.sqrt(fan_in)
        w = jax.random.uniform(kw, (fan_in, fan_out), jnp.float32, -bound, bound)
        b = jax.random.uniform(kb, (fan_out,), jnp.float32, -bound, bound)
        return w, b

    k1, k2, k3 = jax.random.split(key, 3)
    w1, b1 = linear(k1, D_IN, D_H1)
    w2, b2 = linear(k2, D_H1, D_H2)
    w3, b3 = linear(k3, D_H2, D_OUT)
    return (w1, b1, w2, b2, w3, b3)


if __name__ == "__main__":
    key = jax.random.PRNGKey(0)
    k_params, k_x = jax.random.split(key)
    params = init_params(k_params)
    prepped = prepare_params(params)  # one-time weight prep, hoisted out of the forward

    B = 8
    x = jax.random.normal(k_x, (B, D_IN), jnp.float32)

    out = simple_nn_forward(x, prepped)
    out = jax.block_until_ready(out)
    assert out.shape == (B, D_OUT)

    # Pure-JAX f32 reference of the PyTorch SimpleNN forward.
    w1, b1, w2, b2, w3, b3 = params
    h1 = jnp.maximum(x @ w1 + b1, 0.0)
    h2 = jnp.maximum(h1 @ w2 + b2, 0.0)
    ref = h2 @ w3 + b3
    # Only divergence sources: MXU f32 matmul passes and the final bf16 store.
    assert jnp.allclose(out, ref, atol=3e-2, rtol=3e-2), (
        float(jnp.max(jnp.abs(out - ref))))

    print("KERNEL_OK")
</pallas_src>

<mosaic_0001>
module attributes {stable_mosaic.version = 11 : i64} {
  func.func @mlp_kernel(%arg0: i32, %arg1: memref<16x64xf32, #tpu.memory_space<vmem>>, %arg2: memref<64x128xf32, #tpu.memory_space<vmem>>, %arg3: memref<1x128xf32, #tpu.memory_space<vmem>>, %arg4: memref<128x128xf32, #tpu.memory_space<vmem>>, %arg5: memref<1x128xf32, #tpu.memory_space<vmem>>, %arg6: memref<128x128xf32, #tpu.memory_space<vmem>>, %arg7: memref<1x128xf32, #tpu.memory_space<vmem>>, %arg8: memref<16x128xbf16, #tpu.memory_space<vmem>>) attributes {dimension_semantics = [#tpu.dimension_semantics<parallel>], iteration_bounds = array<i64: 1>, scalar_prefetch = 0 : i64, scratch_operands = 0 : i64, tpu.core_type = #tpu.core_type<tc>, window_params = [{transform_indices = @transform_0, window_bounds = array<i64: 16, 64>}, {pipeline_mode = #tpu.pipeline_mode<synchronous>, transform_indices = @transform_1, window_bounds = array<i64: 64, 128>}, {pipeline_mode = #tpu.pipeline_mode<synchronous>, transform_indices = @transform_2, window_bounds = array<i64: 1, 128>}, {pipeline_mode = #tpu.pipeline_mode<synchronous>, transform_indices = @transform_3, window_bounds = array<i64: 128, 128>}, {pipeline_mode = #tpu.pipeline_mode<synchronous>, transform_indices = @transform_4, window_bounds = array<i64: 1, 128>}, {pipeline_mode = #tpu.pipeline_mode<synchronous>, transform_indices = @transform_5, window_bounds = array<i64: 128, 128>}, {pipeline_mode = #tpu.pipeline_mode<synchronous>, transform_indices = @transform_6, window_bounds = array<i64: 1, 128>}, {transform_indices = @transform_7, window_bounds = array<i64: 16, 128>}]} {
    %c0 = arith.constant 0 : index
    %c0_0 = arith.constant 0 : index
    %0 = vector.load %arg1[%c0, %c0_0] : memref<16x64xf32, #tpu.memory_space<vmem>>, vector<16x64xf32>
    %c0_1 = arith.constant 0 : index
    %c0_2 = arith.constant 0 : index
    %1 = vector.load %arg2[%c0_1, %c0_2] : memref<64x128xf32, #tpu.memory_space<vmem>>, vector<64x128xf32>
    %cst = arith.constant dense<0.000000e+00> : vector<16x128xf32>
    %2 = tpu.matmul %0, %1, %cst {dimension_numbers = #tpu.dot_dimension_numbers<[1], [0], [0], [1], [0, 0, 1, 1], [], []>} : vector<16x64xf32>, vector<64x128xf32>, vector<16x128xf32> -> vector<16x128xf32>
    %c0_3 = arith.constant 0 : index
    %c0_4 = arith.constant 0 : index
    %3 = vector.load %arg3[%c0_3, %c0_4] : memref<1x128xf32, #tpu.memory_space<vmem>>, vector<1x128xf32>
    %4 = vector.broadcast %3 : vector<1x128xf32> to vector<16x128xf32>
    %5 = arith.addf %2, %4 : vector<16x128xf32>
    %cst_5 = arith.constant 0.000000e+00 : f32
    %6 = vector.broadcast %cst_5 : f32 to vector<16x128xf32>
    %7 = arith.maximumf %5, %6 : vector<16x128xf32>
    %c0_6 = arith.constant 0 : index
    %c0_7 = arith.constant 0 : index
    %8 = vector.load %arg4[%c0_6, %c0_7] : memref<128x128xf32, #tpu.memory_space<vmem>>, vector<128x128xf32>
    %cst_8 = arith.constant dense<0.000000e+00> : vector<16x128xf32>
    %9 = tpu.matmul %7, %8, %cst_8 {dimension_numbers = #tpu.dot_dimension_numbers<[1], [0], [0], [1], [0, 0, 1, 1], [], []>} : vector<16x128xf32>, vector<128x128xf32>, vector<16x128xf32> -> vector<16x128xf32>
    %c0_9 = arith.constant 0 : index
    %c0_10 = arith.constant 0 : index
    %10 = vector.load %arg5[%c0_9, %c0_10] : memref<1x128xf32, #tpu.memory_space<vmem>>, vector<1x128xf32>
    %11 = vector.broadcast %10 : vector<1x128xf32> to vector<16x128xf32>
    %12 = arith.addf %9, %11 : vector<16x128xf32>
    %cst_11 = arith.constant 0.000000e+00 : f32
    %13 = vector.broadcast %cst_11 : f32 to vector<16x128xf32>
    %14 = arith.maximumf %12, %13 : vector<16x128xf32>
    %c0_12 = arith.constant 0 : index
    %c0_13 = arith.constant 0 : index
    %15 = vector.load %arg6[%c0_12, %c0_13] : memref<128x128xf32, #tpu.memory_space<vmem>>, vector<128x128xf32>
    %cst_14 = arith.constant dense<0.000000e+00> : vector<16x128xf32>
    %16 = tpu.matmul %14, %15, %cst_14 {dimension_numbers = #tpu.dot_dimension_numbers<[1], [0], [0], [1], [0, 0, 1, 1], [], []>} : vector<16x128xf32>, vector<128x128xf32>, vector<16x128xf32> -> vector<16x128xf32>
    %c0_15 = arith.constant 0 : index
    %c0_16 = arith.constant 0 : index
    %17 = vector.load %arg7[%c0_15, %c0_16] : memref<1x128xf32, #tpu.memory_space<vmem>>, vector<1x128xf32>
    %18 = vector.broadcast %17 : vector<1x128xf32> to vector<16x128xf32>
    %19 = arith.addf %16, %18 : vector<16x128xf32>
    %20 = arith.truncf %19 : vector<16x128xf32> to vector<16x128xbf16>
    %c0_17 = arith.constant 0 : index
    %c0_18 = arith.constant 0 : index
    %21 = vector.load %arg8[%c0_17, %c0_18] : memref<16x128xbf16, #tpu.memory_space<vmem>>, vector<16x128xbf16>
    tpu.vector_store %arg8[%c0_17, %c0_18], %20 {strides = array<i32>} : memref<16x128xbf16, #tpu.memory_space<vmem>>, vector<16x128xbf16>,
    return
  }
  func.func @transform_0(%arg0: i32) -> (i32, i32) {
    %c0_i32 = arith.constant 0 : i32
    %c0_i32_0 = arith.constant 0 : i32
    return %arg0, %c0_i32 : i32, i32
  }
  func.func @transform_1(%arg0: i32) -> (i32, i32) {
    %c0_i32 = arith.constant 0 : i32
    %c0_i32_0 = arith.constant 0 : i32
    %c0_i32_1 = arith.constant 0 : i32
    return %c0_i32, %c0_i32_0 : i32, i32
  }
  func.func @transform_2(%arg0: i32) -> (i32, i32) {
    %c0_i32 = arith.constant 0 : i32
    %c0_i32_0 = arith.constant 0 : i32
    %c0_i32_1 = arith.constant 0 : i32
    return %c0_i32, %c0_i32_0 : i32, i32
  }
  func.func @transform_3(%arg0: i32) -> (i32, i32) {
    %c0_i32 = arith.constant 0 : i32
    %c0_i32_0 = arith.constant 0 : i32
    %c0_i32_1 = arith.constant 0 : i32
    return %c0_i32, %c0_i32_0 : i32, i32
  }
  func.func @transform_4(%arg0: i32) -> (i32, i32) {
    %c0_i32 = arith.constant 0 : i32
    %c0_i32_0 = arith.constant 0 : i32
    %c0_i32_1 = arith.constant 0 : i32
    return %c0_i32, %c0_i32_0 : i32, i32
  }
  func.func @transform_5(%arg0: i32) -> (i32, i32) {
    %c0_i32 = arith.constant 0 : i32
    %c0_i32_0 = arith.constant 0 : i32
    %c0_i32_1 = arith.constant 0 : i32
    return %c0_i32, %c0_i32_0 : i32, i32
  }
  func.func @transform_6(%arg0: i32) -> (i32, i32) {
    %c0_i32 = arith.constant 0 : i32
    %c0_i32_0 = arith.constant 0 : i32
    %c0_i32_1 = arith.constant 0 : i32
    return %c0_i32, %c0_i32_0 : i32, i32
  }
  func.func @transform_7(%arg0: i32) -> (i32, i32) {
    %c0_i32 = arith.constant 0 : i32
    %c0_i32_0 = arith.constant 0 : i32
    return %arg0, %c0_i32 : i32, i32
  }
}

</mosaic_0001>

<bundles_post_ra>
// kernel: simple_nn_forward_padded.1
= control target key start
LH: loop header
LB: loop body
LE: loop exit
PB: predicated region body
PF: predicated region fallthrough
CT: control target
= control target key end

     0   :  { %12 = vsyncpa [#allocation3], 0  ;;  %s855_s0 = inlined_call_operand.vmem [shape: f32[16,64], index: 0, kind: input, shape index: {}]   ;;  %s856_s1 = inlined_call_operand.hbm [shape: f32[64,128], index: 1, kind: input, shape index: {}]   ;;  %s857_s2 = inlined_call_operand.vmem [shape: f32[1,128], index: 2, kind: input, shape index: {}]   ;;  %s858_s3 = inlined_call_operand.hbm [shape: f32[128,128], index: 3, kind: input, shape index: {}]   ;;  %s859_s4 = inlined_call_operand.vmem [shape: f32[1,128], index: 4, kind: input, shape index: {}]   ;;  %s860_s5 = inlined_call_operand.hbm [shape: f32[128,128], index: 5, kind: input, shape index: {}]   ;;  %s861_s6 = inlined_call_operand.vmem [shape: f32[1,128], index: 6, kind: input, shape index: {}]   ;;  %s862_s7 = inlined_call_operand.hbm [shape: bf16[16,128], index: 7, kind: output, shape index: {}]  }
   0x1   :  { %13 = vsyncpa [#allocation6], 0 }
   0x2   :  { %14 = vsyncpa [#allocation4], 0  ;;  %s726_s24 = smov [#allocation5]   ;;  %s727_s26 = smov [#allocation2]  }
   0x3   :  { %s36_s25 = sshll.u32 %s726_s24, 4  ;;  %s22_s27 = sshll.u32 %s727_s26, 4  ;;  %s37_s25 = int_to_ptr.vmem [resolvable:$true] %s36_s25  ;;  %s774_s27 = int_to_ptr.vmem [resolvable:$true] %s22_s27 }
   0x4   :  { %s632_s30 = scalar_lea.hbm %s858_s3, 2048 }
   0x5   :  { %p633_p0 = scmp.ne.s32.totalorder %s858_s3, %s632_s30  ;;  %p636_p1 = scmp.lt.u32.totalorder %s632_s30, %s858_s3 }
   0x7   :  { %p638_p2 = pnand %p636_p1, %p633_p0 }
   0x9   :  { %641 = shalt.err (!%p638_p2)
}
   0xa   :  { %s642_s12 = scalar_lea.vmem %s37_s25, 2048  ;;  %p647_p4 = scmp.lt.s32.totalorder %s37_s25, %s37_s25 }
   0xb   :  { %p643_p3 = scmp.ne.s32.totalorder %s37_s25, %s642_s12  ;;  %p648_p5 = scmp.lt.s32.totalorder %s642_s12, %s642_s12 }
   0xd   :  { %p649_p6 = por %p648_p5, %p647_p4 }
   0xf   :  { %p650_p7 = pnand %p649_p6, %p643_p3 }
  0x11   :  { %653 = shalt.err (!%p650_p7)
}
  0x12   :  { %s728_s13 = smov 128   ;;  %s729_s14 = smov 8  }
  0x13   :  { %42 = dma.hbm_to_vmem [thread:$0]  %s858_s3, 2048, %s37_s25, [#allocation6], %s728_s13, %s728_s13, %s729_s14  }
  0x14   :  { %s654_s19 = scalar_lea.hbm %s856_s1, 1024 }
  0x15   :  { %p655_p8 = scmp.ne.s32.totalorder %s856_s1, %s654_s19  ;;  %p658_p9 = scmp.lt.u32.totalorder %s654_s19, %s856_s1 }
  0x17   :  { %p660_p10 = pnand %p658_p9, %p655_p8 }
  0x19   :  { %663 = shalt.err (!%p660_p10)
}
  0x1a   :  { %s664_s24 = scalar_lea.vmem %s774_s27, 1024  ;;  %p669_p12 = scmp.lt.s32.totalorder %s774_s27, %s774_s27 }
  0x1b   :  { %p665_p11 = scmp.ne.s32.totalorder %s774_s27, %s664_s24  ;;  %p670_p13 = scmp.lt.s32.totalorder %s664_s24, %s664_s24 }
  0x1d   :  { %p671_p0 = por %p670_p13, %p669_p12 }
  0x1f   :  { %p672_p1 = pnand %p671_p0, %p665_p11 }
  0x21   :  { %675 = shalt.err (!%p672_p1)
}
  0x22   :  { %28 = dma.hbm_to_vmem [thread:$0]  %s856_s1, 1024, %s774_s27, [#allocation3], %s728_s13, %s728_s13, %s729_s14  }
  0x23   :  { %s730_s26 = smov [#allocation7]   ;;  %s676_s8 = scalar_lea.hbm %s860_s5, 2048 }
  0x24   :  { %s50_s28 = sshll.u32 %s730_s26, 4  ;;  %p677_p2 = scmp.ne.s32.totalorder %s860_s5, %s676_s8  ;;  %s51_s28 = int_to_ptr.vmem [resolvable:$true] %s50_s28 }
  0x25   :  { %p680_p3 = scmp.lt.u32.totalorder %s676_s8, %s860_s5 }
  0x27   :  { %p682_p4 = pnand %p680_p3, %p677_p2 }
  0x29   :  { %685 = shalt.err (!%p682_p4)
}
  0x2a   :  { %s686_s15 = scalar_lea.vmem %s51_s28, 2048  ;;  %p691_p6 = scmp.lt.s32.totalorder %s51_s28, %s51_s28 }
  0x2b   :  { %p687_p5 = scmp.ne.s32.totalorder %s51_s28, %s686_s15  ;;  %p692_p7 = scmp.lt.s32.totalorder %s686_s15, %s686_s15 }
  0x2d   :  { %p693_p8 = por %p692_p7, %p691_p6 }
  0x2f   :  { %p694_p9 = pnand %p693_p8, %p687_p5 }
  0x31   :  { %697 = shalt.err (!%p694_p9)
}
  0x32   :  { %56 = dma.hbm_to_vmem [thread:$0]  %s860_s5, 2048, %s51_s28, [#allocation6], %s728_s13, %s728_s13, %s729_s14  }
  0x33   :  { %720 = dma.done.wait [#allocation3], 1024  }
  0x34   :  { %721 = vsyncadd [#allocation3], 4294966272 }
  0x35   :  { %722 = dma.done.wait [#allocation6], 4096  }
  0x36   :  { %723 = vsyncadd [#allocation6], 4294963200  ;;  %v70_v0 = vld [vmem:[#allocation2] sm:$0xff]  ;;  %v71_v1 = vld [vmem:[#allocation2 + $0x8] sm:$0xff]  ;;  %vm85_vm0 = vcmask 523264   ;;  %s731_s21 = smov [#allocation8]  }
  0x37   :  { %v72_v2 = vld [vmem:[#allocation2 + $0x10] sm:$0xff]  ;;  %v544_v3 = vpack.c.bf16 %v71_v1, %v70_v0  ;;  %v73_v4 = vld [vmem:[#allocation2 + $0x18] sm:$0xff]  ;;  %v74_v6 = vld [vmem:[#allocation2 + $0x20] sm:$0xff]  ;;  %s382_s22 = sshll.u32 %s731_s21, 4  ;;  %s383_s22 = int_to_ptr.vmem [resolvable:$true] %s382_s22 }
  0x38   :  { %v548_v5 = vpack.c.bf16 %v73_v4, %v72_v2  ;;  %v75_v7 = vld [vmem:[#allocation2 + $0x28] sm:$0xff]  ;;  %v68_v8 = vld [vmem:[%s855_s0] sm:$0xff]  ;;  %v171_v12 = vld [vmem:[#allocation5 + $0x10] sm:$0xff]  ;;  %p703_p11 = scmp.lt.s32.totalorder %s383_s22, %s383_s22 }
  0x39   :  { %545 = vmatprep.subr.bf16.mxu0 %v544_v3  ;;  %471 = vmatprep.mubr.msk.f32.mxu0 %vm85_vm0, %v68_v8  ;;  %v169_v9 = vld [vmem:[#allocation5] sm:$0xff]  ;;  %v170_v10 = vld [vmem:[#allocation5 + $0x8] sm:$0xff]  ;;  %v172_v13 = vld [vmem:[#allocation5 + $0x18] sm:$0xff]  ;;  %v552_v14 = vpack.c.bf16 %v75_v7, %v74_v6 }
  0x3a   :  { %547 = vmatpush3.bf16.msra.mxu0 %v544_v3  ;;  %v560_v11 = vpack.c.bf16 %v170_v10, %v169_v9  ;;  %v564_v15 = vpack.c.bf16 %v172_v13, %v171_v12  ;;  %v173_v16 = vld [vmem:[#allocation5 + $0x20] sm:$0xff]  ;;  %v174_v17 = vld [vmem:[#allocation5 + $0x28] sm:$0xff]  ;;  %v76_v18 = vld [vmem:[#allocation2 + $0x30] sm:$0xff] }
  0x3b   :  { %549 = vmatprep.subr.bf16.mxu0 %v548_v5  ;;  %v77_v19 = vld [vmem:[#allocation2 + $0x38] sm:$0xff]  ;;  %v568_v20 = vpack.c.bf16 %v174_v17, %v173_v16  ;;  %v175_v22 = vld [vmem:[#allocation5 + $0x30] sm:$0xff]  ;;  %v177_v25 = vld [vmem:[#allocation5 + $0x40] sm:$0xff] }
  0x3c   :  { %561 = vmatprep.subr.bf16.mxu1 %v560_v11  ;;  %v556_v21 = vpack.c.bf16 %v77_v19, %v76_v18  ;;  %v176_v23 = vld [vmem:[#allocation5 + $0x38] sm:$0xff]  ;;  %v178_v26 = vld [vmem:[#allocation5 + $0x48] sm:$0xff]  ;;  %v179_v29 = vld [vmem:[#allocation5 + $0x50] sm:$0xff] }
  0x3d   :  { %563 = vmatpush3.bf16.msra.mxu1 %v560_v11  ;;  %v572_v24 = vpack.c.bf16 %v176_v23, %v175_v22  ;;  %v69_v27 = vld [vmem:[%s855_s0 + $0x8] sm:$0xff]  ;;  %v576_v28 = vpack.c.bf16 %v178_v26, %v177_v25  ;;  %v180_v30 = vld [vmem:[#allocation5 + $0x58] sm:$0xff]  ;;  %v181_v32 = vld [vmem:[#allocation5 + $0x60] sm:$0xff] }
  0x3e   :  { %551 = vmatpush3.bf16.msra.mxu0 %v548_v5  ;;  %565 = vmatprep.subr.bf16.mxu1 %v564_v15  ;;  %v580_v31 = vpack.c.bf16 %v180_v30, %v179_v29  ;;  %v182_v33 = vld [vmem:[#allocation5 + $0x68] sm:$0xff]  ;;  %v183_v35 = vld [vmem:[#allocation5 + $0x70] sm:$0xff]  ;;  %v184_v36 = vld [vmem:[#allocation5 + $0x78] sm:$0xff] }
  0x3f   :  { %553 = vmatprep.subr.bf16.mxu0 %v552_v14  ;;  %v584_v34 = vpack.c.bf16 %v182_v33, %v181_v32  ;;  %v588_v37 = vpack.c.bf16 %v184_v36, %v183_v35  ;;  %v269_v38 = vld [vmem:[#allocation7] sm:$0xff]  ;;  %v270_v39 = vld [vmem:[#allocation7 + $0x8] sm:$0xff]  ;;  %v271_v40 = vld [vmem:[#allocation7 + $0x10] sm:$0xff] }
  0x40   :  { %v592_v41 = vpack.c.bf16 %v270_v39, %v269_v38  ;;  %v272_v42 = vld [vmem:[#allocation7 + $0x18] sm:$0xff]  ;;  %v273_v44 = vld [vmem:[#allocation7 + $0x20] sm:$0xff]  ;;  %v274_v45 = vld [vmem:[#allocation7 + $0x28] sm:$0xff] }
  0x41   :  { %567 = vmatpush3.bf16.msra.mxu1 %v564_v15  ;;  %v596_v43 = vpack.c.bf16 %v272_v42, %v271_v40  ;;  %v600_v46 = vpack.c.bf16 %v274_v45, %v273_v44  ;;  %v275_v47 = vld [vmem:[#allocation7 + $0x30] sm:$0xff]  ;;  %v276_v48 = vld [vmem:[#allocation7 + $0x38] sm:$0xff]  ;;  %v277_v50 = vld [vmem:[#allocation7 + $0x40] sm:$0xff] }
  0x42   :  { %555 = vmatpush3.bf16.msra.mxu0 %v552_v14  ;;  %569 = vmatprep.subr.bf16.mxu1 %v568_v20  ;;  %v604_v49 = vpack.c.bf16 %v276_v48, %v275_v47  ;;  %v278_v51 = vld [vmem:[#allocation7 + $0x48] sm:$0xff]  ;;  %v279_v53 = vld [vmem:[#allocation7 + $0x50] sm:$0xff]  ;;  %v280_v54 = vld [vmem:[#allocation7 + $0x58] sm:$0xff] }
  0x43   :  { %557 = vmatprep.subr.bf16.mxu0 %v556_v21  ;;  %v608_v52 = vpack.c.bf16 %v278_v51, %v277_v50  ;;  %v612_v55 = vpack.c.bf16 %v280_v54, %v279_v53  ;;  %v281_v56 = vld [vmem:[#allocation7 + $0x60] sm:$0xff]  ;;  %v282_v57 = vld [vmem:[#allocation7 + $0x68] sm:$0xff]  ;;  %v283_v2 = vld [vmem:[#allocation7 + $0x70] sm:$0xff] }
  0x44   :  { %v616_v58 = vpack.c.bf16 %v282_v57, %v281_v56  ;;  %v395_v59 = vld [vmem:[%s857_s2] ss:$0 sm:$0xff]  ;;  %v284_v3 = vld [vmem:[#allocation7 + $0x78] sm:$0xff] }
  0x45   :  { %571 = vmatpush3.bf16.msra.mxu1 %v568_v20  ;;  %v620_v4 = vpack.c.bf16 %v284_v3, %v283_v2  ;;  %v398_v5 = vld [vmem:[%s859_s4] ss:$0 sm:$0xff]  ;;  %s698_s4 = scalar_lea.vmem %s383_s22, 128 }
  0x46   :  { %559 = vmatpush3.bf16.msra.mxu0 %v556_v21  ;;  %573 = vmatprep.subr.bf16.mxu1 %v572_v24  ;;  %v399_v12 = vld [vmem:[%s861_s6] ss:$0 sm:$0xff]  ;;  %p699_p10 = scmp.ne.s32.totalorder %s383_s22, %s698_s4  ;;  %p704_p12 = scmp.lt.s32.totalorder %s698_s4, %s698_s4 }
  0x47   :  { %593 = vmatprep.subr.bf16.mxu0 %v592_v41 }
  0x48   :  { %p705_p13 = por %p704_p12, %p703_p11 }
  0x49   :  { %472 = vmatmul.mubr.msk.f32.vlgmr.msra.gmra.mrb[0].mxu0 %vm85_vm0, %v69_v27  ;;  %575 = vmatpush3.bf16.msra.mxu1 %v572_v24 }
  0x4a   :  { %577 = vmatprep.subr.bf16.mxu1 %v576_v28  ;;  %595 = vmatpush3.bf16.msra.mxu0 %v592_v41  ;;  %p706_p0 = pnand %p705_p13, %p699_p10 }
  0x4b   :  { %597 = vmatprep.subr.bf16.mxu0 %v596_v43 }
  0x4d   :  { %579 = vmatpush3.bf16.msra.mxu1 %v576_v28 }
  0x4e   :  { %581 = vmatprep.subr.bf16.mxu1 %v580_v31  ;;  %599 = vmatpush3.bf16.msra.mxu0 %v596_v43 }
  0x4f   :  { %601 = vmatprep.subr.bf16.mxu0 %v600_v46 }
  0x51   :  { %583 = vmatpush3.bf16.msra.mxu1 %v580_v31 }
  0x52   :  { %585 = vmatprep.subr.bf16.mxu1 %v584_v34  ;;  %603 = vmatpush3.bf16.msra.mxu0 %v600_v46 }
  0x53   :  { %605 = vmatprep.subr.bf16.mxu0 %v604_v49 }
  0x55   :  { %587 = vmatpush3.bf16.msra.mxu1 %v584_v34 }
  0x56   :  { %589 = vmatprep.subr.bf16.mxu1 %v588_v37  ;;  %607 = vmatpush3.bf16.msra.mxu0 %v604_v49 }
  0x57   :  { %609 = vmatprep.subr.bf16.mxu0 %v608_v52 }
  0x59   :  { %591 = vmatpush3.bf16.msra.mxu1 %v588_v37 }
  0x5a   :  { %611 = vmatpush3.bf16.msra.mxu0 %v608_v52 }
  0x5b   :  { %613 = vmatprep.subr.bf16.mxu0 %v612_v55 }
  0x5e   :  { %615 = vmatpush3.bf16.msra.mxu0 %v612_v55 }
  0x5f   :  { %617 = vmatprep.subr.bf16.mxu0 %v616_v58 }
  0x62   :  { %619 = vmatpush3.bf16.msra.mxu0 %v616_v58 }
  0x63   :  { %621 = vmatprep.subr.bf16.mxu0 %v620_v4 }
  0x66   :  { %623 = vmatpush3.bf16.msra.mxu0 %v620_v4 }
 0x11c   :  { %v473_v60 = vpop.f32.mrb[0].mxu0 }
 0x11d   :  { %v164_v61 = vadd.f32 %v473_v60, %v395_v59  ;;  %v158_v62 = vpop.f32.mrb[1].mxu0 }
 0x11e   :  { %v159_v63 = vadd.f32 %v395_v59, %v158_v62 }
 0x11f   :  { %v168_v1 = vmax.f32 %v164_v61, 0.0 }
 0x120   :  { %v167_v0 = vmax.f32 %v159_v63, 0.0 }
 0x122   :  { %506 = vmatprep.mubr.f32.mxu1 %v167_v0 }
 0x123   :  { %507 = vmatmul.mubr.f32.vlgmr.msra.gmra.mrb[0].mxu1 %v168_v1 }
 0x1f6   :  { %v508_v6 = vpop.f32.mrb[0].mxu1 }
 0x1f7   :  { %v264_v7 = vadd.f32 %v508_v6, %v398_v5  ;;  %v258_v8 = vpop.f32.mrb[1].mxu1 }
 0x1f8   :  { %v259_v9 = vadd.f32 %v398_v5, %v258_v8 }
 0x1f9   :  { %v268_v11 = vmax.f32 %v264_v7, 0.0 }
 0x1fa   :  { %v267_v10 = vmax.f32 %v259_v9, 0.0 }
 0x1fc   :  { %541 = vmatprep.mubr.f32.mxu0 %v267_v10 }
 0x1fd   :  { %542 = vmatmul.mubr.f32.vlgmr.msra.gmra.mrb[2].mxu0 %v268_v11 }
 0x2d0   :  { %v543_v13 = vpop.f32.mrb[2].mxu0 }
 0x2d1   :  { %v364_v14 = vadd.f32 %v543_v13, %v399_v12  ;;  %v358_v15 = vpop.f32.mrb[3].mxu0 }
 0x2d2   :  { %v359_v16 = vadd.f32 %v399_v12, %v358_v15 }
 0x2d4   :  { %v407_v17 = vpack.c.bf16 %v364_v14, %v359_v16 }
 0x2d6   :  { %408 = vst [vmem:[#allocation8] sm:$0xff] %v407_v17  }
 0x2d7   :  { %709 = shalt.err (!%p706_p0)
}
 0x2d8   :  { %s710_s6 = scalar_lea.hbm %s862_s7, 128 }
 0x2d9   :  { %p711_p1 = scmp.ne.s32.totalorder %s862_s7, %s710_s6  ;;  %p714_p2 = scmp.lt.u32.totalorder %s710_s6, %s862_s7 }
 0x2db   :  { %p716_p3 = pnand %p714_p2, %p711_p1 }
 0x2dd   :  { %719 = shalt.err (!%p716_p3)
}
 0x2de   :  { %s732_s29 = smov 64   ;;  %s733_s30 = smov 4  }
 0x2df   :  { %388 = dma.vmem_to_hbm [thread:$0]  %s383_s22, 128, %s862_s7, [#allocation4], %s732_s29, %s732_s29, %s733_s30  }
 0x2e0   :  { %724 = dma.done.wait [#allocation4], 128  }
 0x2e1   :  { %725 = vsyncadd [#allocation4], 4294967168 }
 0x2e2   :  { %392 = vsyncpa [#allocation3], 1 }
 0x2e3   :  { %393 = vsyncpa [#allocation6], 1 }
 0x2e4   :  { %394 = vsyncpa [#allocation4], 1 }

</bundles_post_ra>
